<compile_context>
chip_gen: v5e
topology: v5e:2x2
jax: 0.10.0
libtpu: 0.0.40
codegen_flags: <defaults>
</compile_context>

<pallas_src>
import functools

import jax
import jax.numpy as jnp
from jax import lax
from jax.experimental import pallas as pl
from jax.experimental.pallas import tpu as pltpu


# --------------------------------------------------------------------------
# Small constants built in the wrapper (shape-only, a few KiB).
# --------------------------------------------------------------------------
def _tap_masks(H, W):
    """(9, H*W) 0/1 mask: mask[t, y*W + x] = 1 iff the t-th 3x3 tap stays inside the image."""
    idx = jnp.arange(H * W)
    yy = idx // W
    xx = idx % W
    rows = []
    for dy in (-1, 0, 1):
        for dx in (-1, 0, 1):
            ok = (yy + dy >= 0) & (yy + dy < H) & (xx + dx >= 0) & (xx + dx < W)
            rows.append(ok)
    return jnp.stack(rows).astype(jnp.float32)


# --------------------------------------------------------------------------
# Single fused kernel: one grid step == one batch element.
#   x block : (1, C*N, HW) -> out block : (1, C*N, HW) = 0.5*x + sigmoid(SAL*TAL*CAL)*x
# --------------------------------------------------------------------------
def ral_kernel(x_ref, amat_ref, w9c_ref, mask_ref, w21_ref, w22_ref, wt_ref,
               bn_ref, ecn_ref, o_ref, *, C, N, C16, W):
    HW = x_ref.shape[2]
    x = x_ref[0]                                              # (C*N, HW), dense (8,128) tiles

    # ---- global means: one MXU matmul against a constant averaging matrix -------------------
    red = jnp.dot(amat_ref[...], x, preferred_element_type=jnp.float32)   # (C+N, HW)
    m = red[:C, :]                                            # (C, HW)  mean over frames (SAL)
    gap = jnp.mean(red, axis=1, keepdims=True)                # (C+N, 1) spatial means
    gap_c = gap[:C, :]                                        # (C, 1)   CAL input
    gap_t = gap[C:, :]                                        # (N, 1)   TAL input

    # ---- SAL: 3x3 conv (C -> 1, pad=1) = dense C-contraction + 9 masked static lane shifts --
    g = jnp.dot(w9c_ref[...], m, preferred_element_type=jnp.float32)      # (9, HW)
    shifted = []
    t = 0
    for dy in (-1, 0, 1):
        for dx in (-1, 0, 1):
            off = dy * W + dx                                 # static flattened tap offset
            row = g[t:t + 1, :]
            if off > 0:
                row = jnp.concatenate(
                    [row[:, off:], jnp.zeros((1, off), jnp.float32)], axis=1)
            elif off < 0:
                row = jnp.concatenate(
                    [jnp.zeros((1, -off), jnp.float32), row[:, :HW + off]], axis=1)
            shifted.append(row)
            t += 1
    # tap mask zeroes every row-wrap / out-of-image position; single sublane reduce accumulates
    conv = jnp.sum(jnp.concatenate(shifted, axis=0) * mask_ref[...],
                   axis=0, keepdims=True)                     # (1, HW)

    R = bn_ref.shape[0] - 1                                   # last row = folded SAL scalars
    a1 = bn_ref[R:R + 1, 0:1]                                 # s11 * w12
    c1 = bn_ref[R:R + 1, 1:2]                                 # b11 * w12
    s12 = bn_ref[R:R + 1, 2:3]
    b12 = bn_ref[R:R + 1, 3:4]
    # relu -> BN1 -> 1x1 conv (scalar) folded -> relu -> BN2
    sal = jnp.maximum(jnp.maximum(conv, 0.0) * a1 + c1, 0.0) * s12 + b12  # (1, HW)

    # ---- CAL: two 1x1 convs (MLP) on the (C, 1) channel descriptor ---------------------------
    s21 = bn_ref[:C16, 0:1]; b21 = bn_ref[:C16, 1:2]
    s22 = bn_ref[:C, 2:3];   b22 = bn_ref[:C, 3:4]
    h = jnp.maximum(jnp.dot(w21_ref[...], gap_c, preferred_element_type=jnp.float32), 0.0)
    h = h * s21 + b21
    cal = jnp.maximum(jnp.dot(w22_ref[...], h, preferred_element_type=jnp.float32), 0.0)
    cal = cal * s22 + b22                                     # (C, 1)

    # ---- TAL: two 1x1 convs (MLP) on the (N, 1) temporal descriptor --------------------------
    s31 = bn_ref[:N, 4:5]; b31 = bn_ref[:N, 5:6]
    s32 = bn_ref[:N, 6:7]; b32 = bn_ref[:N, 7:8]
    ht = jnp.maximum(jnp.dot(wt_ref[:N, :], gap_t, preferred_element_type=jnp.float32), 0.0)
    ht = ht * s31 + b31
    tal = jnp.maximum(jnp.dot(wt_ref[N:, :], ht, preferred_element_type=jnp.float32), 0.0)
    tal = tal * s32 + b32                                     # (N, 1)

    # ---- expand cal/tal onto the flattened C*N row axis with tiny 0/1 matmuls (no reshapes) --
    rscale = (jnp.dot(ecn_ref[:, :C], cal, preferred_element_type=jnp.float32) *
              jnp.dot(ecn_ref[:, C:], tal, preferred_element_type=jnp.float32))   # (C*N, 1)
    att = rscale * sal                                        # (C*N, HW)

    # 0.5*x + sigmoid(att)*x  ==  x * (1 + 0.5*tanh(0.5*att)); tanh runs on the EUP (no divide).
    o_ref[...] = (x * (1.0 + 0.5 * jnp.tanh(0.5 * att)))[None]


# --------------------------------------------------------------------------
# Wrapper: one pallas_call, grid over batch, everything else is thin reshape glue.
# --------------------------------------------------------------------------
def ral_forward(x, p):
    B, C, N, H, W = x.shape
    HW = H * W
    CN = C * N
    C16 = max(C // 16, 1)
    f32 = jnp.float32

    xf = x.reshape(B, CN, HW)                 # frame axis folded into sublanes (dense tiles)

    # Averaging matrix: rows [0:C] -> mean over frames, rows [C:C+N] -> mean over channels.
    a_frame = jnp.kron(jnp.eye(C, dtype=f32), jnp.ones((1, N), f32)) / N        # (C, C*N)
    a_chan = jnp.kron(jnp.ones((1, C), f32), jnp.eye(N, dtype=f32)) / C         # (N, C*N)
    amat = jnp.concatenate([a_frame, a_chan], axis=0)                           # (C+N, C*N)

    # 0/1 expansion matrices mapping (C,1)/(N,1) vectors onto the C*N row axis.
    ec = jnp.kron(jnp.eye(C, dtype=f32), jnp.ones((N, 1), f32))                 # (C*N, C)
    en = jnp.kron(jnp.ones((C, 1), f32), jnp.eye(N, dtype=f32))                 # (C*N, N)
    ecn = jnp.concatenate([ec, en], axis=1)                                     # (C*N, C+N)

    w9c = jnp.transpose(p["w11"].reshape(C, 9)).astype(f32)                     # (9, C)
    mask9 = _tap_masks(H, W)                                                    # (9, HW)

    w21 = p["w21"][:, :, 0, 0].astype(f32)                                      # (C16, C)
    w22 = p["w22"][:, :, 0, 0].astype(f32)                                      # (C, C16)
    wt = jnp.concatenate([p["w31"][:, :, 0, 0],
                          p["w32"][:, :, 0, 0]], axis=0).astype(f32)            # (2N, N)

    # BN scale/shift columns packed into one matrix; last row carries the folded SAL scalars
    # (a1 = s11*w12, c1 = b11*w12, then s12, b12).
    R = max(C, N, C16)

    def col(v):
        v = jnp.asarray(v, f32).reshape(-1)
        return jnp.pad(v, (0, R - v.shape[0]))

    sal_row = (jnp.zeros((8,), f32)
               .at[0].set(p["s11"][0] * p["w12"][0, 0, 0, 0])
               .at[1].set(p["b11"][0] * p["w12"][0, 0, 0, 0])
               .at[2].set(p["s12"][0])
               .at[3].set(p["b12"][0]))
    bnall = jnp.stack([col(p["s21"]), col(p["b21"]), col(p["s22"]), col(p["b22"]),
                       col(p["s31"]), col(p["b31"]), col(p["s32"]), col(p["b32"])],
                      axis=1)                                                   # (R, 8)
    bnall = jnp.concatenate([bnall, sal_row[None, :]], axis=0)                  # (R+1, 8)

    small = (amat, w9c, mask9, w21, w22, wt, bnall, ecn)

    # Generation-aware VMEM budget: in/out slabs double-buffered (4x slab) + constants + margin,
    # capped below physical VMEM (128 MiB v5e/v6e, 64 MiB v7x).
    slab_bytes = CN * HW * 4
    const_bytes = sum(int(a.size) * 4 for a in small)
    need = 4 * slab_bytes + 2 * const_bytes + (4 << 20)
    try:
        cap = int(pltpu.get_tpu_info().vmem_capacity_bytes)
    except Exception:
        cap = 64 << 20                       # conservative fallback (v7x per-TensorCore VMEM)
    vmem_limit = int(max(32 << 20, min(need, int(cap * 0.9))))

    in_specs = [pl.BlockSpec((1, CN, HW), lambda b: (b, 0, 0))]
    in_specs += [pl.BlockSpec(a.shape, lambda b: (0, 0)) for a in small]

    out4 = pl.pallas_call(
        functools.partial(ral_kernel, C=C, N=N, C16=C16, W=W),
        grid=(B,),
        in_specs=in_specs,
        out_specs=pl.BlockSpec((1, CN, HW), lambda b: (b, 0, 0)),
        out_shape=jax.ShapeDtypeStruct((B, CN, HW), jnp.float32),
        compiler_params=pltpu.CompilerParams(
            dimension_semantics=("parallel",),   # shards batches across v7x's 2 TensorCores
            vmem_limit_bytes=vmem_limit,
        ),
    )(xf, *small)
    return out4.reshape(B, C, N, H, W)


# --------------------------------------------------------------------------
# Pure-JAX reference (mirrors the PyTorch forward, eval-mode BN).
# --------------------------------------------------------------------------
def _basic_ref(x, w, scale, shift, pad):
    y = lax.conv_general_dilated(x, w, (1, 1), [(pad, pad), (pad, pad)],
                                 dimension_numbers=("NCHW", "OIHW", "NCHW"))
    y = jnp.maximum(y, 0.0)
    return y * scale.reshape(1, -1, 1, 1) + shift.reshape(1, -1, 1, 1)


def ral_reference(x, p):
    mean_n = jnp.mean(x, axis=2)
    x_SAL = _basic_ref(_basic_ref(mean_n, p["w11"], p["s11"], p["b11"], 1),
                       p["w12"], p["s12"], p["b12"], 0)[:, :, None]          # (B,1,1,H,W)
    gap_c = jnp.mean(mean_n, axis=(2, 3), keepdims=True)                     # (B,C,1,1)
    x_CAL = _basic_ref(_basic_ref(gap_c, p["w21"], p["s21"], p["b21"], 0),
                       p["w22"], p["s22"], p["b22"], 0)[:, :, None]          # (B,C,1,1,1)
    gap_t = jnp.mean(jnp.mean(x, axis=1), axis=(2, 3), keepdims=True)        # (B,N,1,1)
    x_TAL = _basic_ref(_basic_ref(gap_t, p["w31"], p["s31"], p["b31"], 0),
                       p["w32"], p["s32"], p["b32"], 0)[:, None]             # (B,1,N,1,1)
    x_RAL = jax.nn.sigmoid(x_SAL * x_TAL * x_CAL) * x
    return 0.5 * x + x_RAL


# --------------------------------------------------------------------------
def make_params(key, C, N):
    C16 = max(C // 16, 1)
    eps = 1e-5
    ks = jax.random.split(key, 12)

    def bn(k, ch):
        gamma = 1.0 + 0.1 * jax.random.normal(k, (ch,), jnp.float32)
        beta = 0.05 * jax.random.normal(jax.random.fold_in(k, 1), (ch,), jnp.float32)
        scale = gamma / jnp.sqrt(1.0 + eps)    # running_var = 1
        shift = beta                           # running_mean = 0
        return scale, shift

    p = {}
    p["w11"] = 0.1 * jax.random.normal(ks[0], (1, C, 3, 3), jnp.float32)
    p["s11"], p["b11"] = bn(ks[1], 1)
    p["w12"] = 0.5 + 0.1 * jax.random.normal(ks[2], (1, 1, 1, 1), jnp.float32)
    p["s12"], p["b12"] = bn(ks[3], 1)
    p["w21"] = 0.2 * jax.random.normal(ks[4], (C16, C, 1, 1), jnp.float32)
    p["s21"], p["b21"] = bn(ks[5], C16)
    p["w22"] = 0.2 * jax.random.normal(ks[6], (C, C16, 1, 1), jnp.float32)
    p["s22"], p["b22"] = bn(ks[7], C)
    p["w31"] = 0.2 * jax.random.normal(ks[8], (N, N, 1, 1), jnp.float32)
    p["s31"], p["b31"] = bn(ks[9], N)
    p["w32"] = 0.2 * jax.random.normal(ks[10], (N, N, 1, 1), jnp.float32)
    p["s32"], p["b32"] = bn(ks[11], N)
    return p


if __name__ == "__main__":
    B, C, N, H, W = 2, 16, 4, 16, 16          # in_channels=16, frame_num=4
    key = jax.random.PRNGKey(0)
    kx, kp = jax.random.split(key)
    x = jax.random.normal(kx, (B, C, N, H, W), jnp.float32)
    params = make_params(kp, C, N)

    out = jax.jit(ral_forward)(x, params)
    out = jax.block_until_ready(out)

    ref = ral_reference(x, params)
    assert out.shape == (B, C, N, H, W)
    err = float(jnp.max(jnp.abs(out - ref)))
    assert jnp.allclose(out, ref, atol=1e-4, rtol=1e-4), err
    print("KERNEL_OK")
</pallas_src>

<mosaic_0001>
module attributes {stable_mosaic.version = 11 : i64} {
  func.func @ral_kernel(%arg0: i32, %arg1: memref<1x64x256xf32, #tpu.memory_space<vmem>>, %arg2: memref<20x64xf32, #tpu.memory_space<vmem>>, %arg3: memref<9x16xf32, #tpu.memory_space<vmem>>, %arg4: memref<9x256xf32, #tpu.memory_space<vmem>>, %arg5: memref<1x16xf32, #tpu.memory_space<vmem>>, %arg6: memref<16x1xf32, #tpu.memory_space<vmem>>, %arg7: memref<8x4xf32, #tpu.memory_space<vmem>>, %arg8: memref<17x8xf32, #tpu.memory_space<vmem>>, %arg9: memref<64x20xf32, #tpu.memory_space<vmem>>, %arg10: memref<1x64x256xf32, #tpu.memory_space<vmem>>) attributes {dimension_semantics = [#tpu.dimension_semantics<parallel>], iteration_bounds = array<i64: 2>, scalar_prefetch = 0 : i64, scratch_operands = 0 : i64, tpu.core_type = #tpu.core_type<tc>, window_params = [{transform_indices = @transform_0, window_bounds = array<i64: 1, 64, 256>}, {pipeline_mode = #tpu.pipeline_mode<synchronous>, transform_indices = @transform_1, window_bounds = array<i64: 20, 64>}, {pipeline_mode = #tpu.pipeline_mode<synchronous>, transform_indices = @transform_2, window_bounds = array<i64: 9, 16>}, {pipeline_mode = #tpu.pipeline_mode<synchronous>, transform_indices = @transform_3, window_bounds = array<i64: 9, 256>}, {pipeline_mode = #tpu.pipeline_mode<synchronous>, transform_indices = @transform_4, window_bounds = array<i64: 1, 16>}, {pipeline_mode = #tpu.pipeline_mode<synchronous>, transform_indices = @transform_5, window_bounds = array<i64: 16, 1>}, {pipeline_mode = #tpu.pipeline_mode<synchronous>, transform_indices = @transform_6, window_bounds = array<i64: 8, 4>}, {pipeline_mode = #tpu.pipeline_mode<synchronous>, transform_indices = @transform_7, window_bounds = array<i64: 17, 8>}, {pipeline_mode = #tpu.pipeline_mode<synchronous>, transform_indices = @transform_8, window_bounds = array<i64: 64, 20>}, {transform_indices = @transform_9, window_bounds = array<i64: 1, 64, 256>}]} {
    %c0 = arith.constant 0 : index
    %c0_0 = arith.constant 0 : index
    %c0_1 = arith.constant 0 : index
    %0 = vector.load %arg1[%c0, %c0_0, %c0_1] : memref<1x64x256xf32, #tpu.memory_space<vmem>>, vector<1x64x256xf32>
    %1 = vector.shape_cast %0 : vector<1x64x256xf32> to vector<64x256xf32>
    %c0_2 = arith.constant 0 : index
    %c0_3 = arith.constant 0 : index
    %2 = vector.load %arg2[%c0_2, %c0_3] : memref<20x64xf32, #tpu.memory_space<vmem>>, vector<20x64xf32>
    %cst = arith.constant dense<0.000000e+00> : vector<20x256xf32>
    %3 = tpu.matmul %2, %1, %cst {dimension_numbers = #tpu.dot_dimension_numbers<[1], [0], [0], [1], [0, 0, 1, 1], [], []>} : vector<20x64xf32>, vector<64x256xf32>, vector<20x256xf32> -> vector<20x256xf32>
    %4 = vector.extract_strided_slice %3 {offsets = [0, 0], sizes = [16, 256], strides = [1, 1]} : vector<20x256xf32> to vector<16x256xf32>
    %cst_4 = arith.constant dense<0.000000e+00> : vector<20xf32>
    %5 = vector.multi_reduction <add>, %3, %cst_4 [1] : vector<20x256xf32> to vector<20xf32>
    %6 = vector.shape_cast %5 : vector<20xf32> to vector<20x1xf32>
    %cst_5 = arith.constant 2.560000e+02 : f32
    %7 = vector.broadcast %cst_5 : f32 to vector<20x1xf32>
    %8 = arith.divf %6, %7 : vector<20x1xf32>
    %9 = vector.extract_strided_slice %8 {offsets = [0, 0], sizes = [16, 1], strides = [1, 1]} : vector<20x1xf32> to vector<16x1xf32>
    %10 = vector.extract_strided_slice %8 {offsets = [16, 0], sizes = [4, 1], strides = [1, 1]} : vector<20x1xf32> to vector<4x1xf32>
    %c0_6 = arith.constant 0 : index
    %c0_7 = arith.constant 0 : index
    %11 = vector.load %arg3[%c0_6, %c0_7] : memref<9x16xf32, #tpu.memory_space<vmem>>, vector<9x16xf32>
    %cst_8 = arith.constant dense<0.000000e+00> : vector<9x256xf32>
    %12 = tpu.matmul %11, %4, %cst_8 {dimension_numbers = #tpu.dot_dimension_numbers<[1], [0], [0], [1], [0, 0, 1, 1], [], []>} : vector<9x16xf32>, vector<16x256xf32>, vector<9x256xf32> -> vector<9x256xf32>
    %13 = vector.extract_strided_slice %12 {offsets = [0, 0], sizes = [1, 256], strides = [1, 1]} : vector<9x256xf32> to vector<1x256xf32>
    %cst_9 = arith.constant 0.000000e+00 : f32
    %14 = vector.broadcast %cst_9 : f32 to vector<1x17xf32>
    %15 = vector.extract_strided_slice %13 {offsets = [0, 0], sizes = [1, 239], strides = [1, 1]} : vector<1x256xf32> to vector<1x239xf32>
    %16 = tpu.concatenate %14, %15 in 1 : vector<1x17xf32>, vector<1x239xf32> -> vector<1x256xf32>
    %17 = vector.extract_strided_slice %12 {offsets = [1, 0], sizes = [1, 256], strides = [1, 1]} : vector<9x256xf32> to vector<1x256xf32>
    %cst_10 = arith.constant 0.000000e+00 : f32
    %18 = vector.broadcast %cst_10 : f32 to vector<1x16xf32>
    %19 = vector.extract_strided_slice %17 {offsets = [0, 0], sizes = [1, 240], strides = [1, 1]} : vector<1x256xf32> to vector<1x240xf32>
    %20 = tpu.concatenate %18, %19 in 1 : vector<1x16xf32>, vector<1x240xf32> -> vector<1x256xf32>
    %21 = vector.extract_strided_slice %12 {offsets = [2, 0], sizes = [1, 256], strides = [1, 1]} : vector<9x256xf32> to vector<1x256xf32>
    %cst_11 = arith.constant 0.000000e+00 : f32
    %22 = vector.broadcast %cst_11 : f32 to vector<1x15xf32>
    %23 = vector.extract_strided_slice %21 {offsets = [0, 0], sizes = [1, 241], strides = [1, 1]} : vector<1x256xf32> to vector<1x241xf32>
    %24 = tpu.concatenate %22, %23 in 1 : vector<1x15xf32>, vector<1x241xf32> -> vector<1x256xf32>
    %25 = vector.extract_strided_slice %12 {offsets = [3, 0], sizes = [1, 256], strides = [1, 1]} : vector<9x256xf32> to vector<1x256xf32>
    %cst_12 = arith.constant 0.000000e+00 : f32
    %26 = vector.broadcast %cst_12 : f32 to vector<1x1xf32>
    %27 = vector.extract_strided_slice %25 {offsets = [0, 0], sizes = [1, 255], strides = [1, 1]} : vector<1x256xf32> to vector<1x255xf32>
    %28 = tpu.concatenate %26, %27 in 1 : vector<1x1xf32>, vector<1x255xf32> -> vector<1x256xf32>
    %29 = vector.extract_strided_slice %12 {offsets = [4, 0], sizes = [1, 256], strides = [1, 1]} : vector<9x256xf32> to vector<1x256xf32>
    %30 = vector.extract_strided_slice %12 {offsets = [5, 0], sizes = [1, 256], strides = [1, 1]} : vector<9x256xf32> to vector<1x256xf32>
    %31 = vector.extract_strided_slice %30 {offsets = [0, 1], sizes = [1, 255], strides = [1, 1]} : vector<1x256xf32> to vector<1x255xf32>
    %cst_13 = arith.constant 0.000000e+00 : f32
    %32 = vector.broadcast %cst_13 : f32 to vector<1x1xf32>
    %33 = tpu.concatenate %31, %32 in 1 : vector<1x255xf32>, vector<1x1xf32> -> vector<1x256xf32>
    %34 = vector.extract_strided_slice %12 {offsets = [6, 0], sizes = [1, 256], strides = [1, 1]} : vector<9x256xf32> to vector<1x256xf32>
    %35 = vector.extract_strided_slice %34 {offsets = [0, 15], sizes = [1, 241], strides = [1, 1]} : vector<1x256xf32> to vector<1x241xf32>
    %cst_14 = arith.constant 0.000000e+00 : f32
    %36 = vector.broadcast %cst_14 : f32 to vector<1x15xf32>
    %37 = tpu.concatenate %35, %36 in 1 : vector<1x241xf32>, vector<1x15xf32> -> vector<1x256xf32>
    %38 = vector.extract_strided_slice %12 {offsets = [7, 0], sizes = [1, 256], strides = [1, 1]} : vector<9x256xf32> to vector<1x256xf32>
    %39 = vector.extract_strided_slice %38 {offsets = [0, 16], sizes = [1, 240], strides = [1, 1]} : vector<1x256xf32> to vector<1x240xf32>
    %cst_15 = arith.constant 0.000000e+00 : f32
    %40 = vector.broadcast %cst_15 : f32 to vector<1x16xf32>
    %41 = tpu.concatenate %39, %40 in 1 : vector<1x240xf32>, vector<1x16xf32> -> vector<1x256xf32>
    %42 = vector.extract_strided_slice %12 {offsets = [8, 0], sizes = [1, 256], strides = [1, 1]} : vector<9x256xf32> to vector<1x256xf32>
    %43 = vector.extract_strided_slice %42 {offsets = [0, 17], sizes = [1, 239], strides = [1, 1]} : vector<1x256xf32> to vector<1x239xf32>
    %cst_16 = arith.constant 0.000000e+00 : f32
    %44 = vector.broadcast %cst_16 : f32 to vector<1x17xf32>
    %45 = tpu.concatenate %43, %44 in 1 : vector<1x239xf32>, vector<1x17xf32> -> vector<1x256xf32>
    %46 = tpu.concatenate %16, %20, %24, %28, %29, %33, %37, %41, %45 in 0 : vector<1x256xf32>, vector<1x256xf32>, vector<1x256xf32>, vector<1x256xf32>, vector<1x256xf32>, vector<1x256xf32>, vector<1x256xf32>, vector<1x256xf32>, vector<1x256xf32> -> vector<9x256xf32>
    %c0_17 = arith.constant 0 : index
    %c0_18 = arith.constant 0 : index
    %47 = vector.load %arg4[%c0_17, %c0_18] : memref<9x256xf32, #tpu.memory_space<vmem>>, vector<9x256xf32>
    %48 = arith.mulf %46, %47 : vector<9x256xf32>
    %cst_19 = arith.constant dense<0.000000e+00> : vector<256xf32>
    %49 = vector.multi_reduction <add>, %48, %cst_19 [0] : vector<9x256xf32> to vector<256xf32>
    %50 = vector.shape_cast %49 : vector<256xf32> to vector<1x256xf32>
    %c16 = arith.constant 16 : index
    %c0_20 = arith.constant 0 : index
    %51 = vector.load %arg8[%c16, %c0_20] : memref<17x8xf32, #tpu.memory_space<vmem>>, vector<1x1xf32>
    %c16_21 = arith.constant 16 : index
    %c1 = arith.constant 1 : index
    %52 = vector.load %arg8[%c16_21, %c1] : memref<17x8xf32, #tpu.memory_space<vmem>>, vector<1x1xf32>
    %c16_22 = arith.constant 16 : index
    %c2 = arith.constant 2 : index
    %53 = vector.load %arg8[%c16_22, %c2] : memref<17x8xf32, #tpu.memory_space<vmem>>, vector<1x1xf32>
    %c16_23 = arith.constant 16 : index
    %c3 = arith.constant 3 : index
    %54 = vector.load %arg8[%c16_23, %c3] : memref<17x8xf32, #tpu.memory_space<vmem>>, vector<1x1xf32>
    %cst_24 = arith.constant 0.000000e+00 : f32
    %55 = vector.broadcast %cst_24 : f32 to vector<1x256xf32>
    %56 = arith.maximumf %50, %55 : vector<1x256xf32>
    %57 = vector.broadcast %51 : vector<1x1xf32> to vector<1x256xf32>
    %58 = arith.mulf %56, %57 : vector<1x256xf32>
    %59 = vector.broadcast %52 : vector<1x1xf32> to vector<1x256xf32>
    %60 = arith.addf %58, %59 : vector<1x256xf32>
    %cst_25 = arith.constant 0.000000e+00 : f32
    %61 = vector.broadcast %cst_25 : f32 to vector<1x256xf32>
    %62 = arith.maximumf %60, %61 : vector<1x256xf32>
    %63 = vector.broadcast %53 : vector<1x1xf32> to vector<1x256xf32>
    %64 = arith.mulf %62, %63 : vector<1x256xf32>
    %65 = vector.broadcast %54 : vector<1x1xf32> to vector<1x256xf32>
    %66 = arith.addf %64, %65 : vector<1x256xf32>
    %c0_26 = arith.constant 0 : index
    %c0_27 = arith.constant 0 : index
    %67 = vector.load %arg8[%c0_26, %c0_27] : memref<17x8xf32, #tpu.memory_space<vmem>>, vector<1x1xf32>
    %c0_28 = arith.constant 0 : index
    %c1_29 = arith.constant 1 : index
    %68 = vector.load %arg8[%c0_28, %c1_29] : memref<17x8xf32, #tpu.memory_space<vmem>>, vector<1x1xf32>
    %c0_30 = arith.constant 0 : index
    %c2_31 = arith.constant 2 : index
    %69 = vector.load %arg8[%c0_30, %c2_31] : memref<17x8xf32, #tpu.memory_space<vmem>>, vector<16x1xf32>
    %c0_32 = arith.constant 0 : index
    %c3_33 = arith.constant 3 : index
    %70 = vector.load %arg8[%c0_32, %c3_33] : memref<17x8xf32, #tpu.memory_space<vmem>>, vector<16x1xf32>
    %c0_34 = arith.constant 0 : index
    %c0_35 = arith.constant 0 : index
    %71 = vector.load %arg5[%c0_34, %c0_35] : memref<1x16xf32, #tpu.memory_space<vmem>>, vector<1x16xf32>
    %cst_36 = arith.constant dense<0.000000e+00> : vector<1x1xf32>
    %72 = tpu.matmul %71, %9, %cst_36 {dimension_numbers = #tpu.dot_dimension_numbers<[1], [0], [0], [1], [0, 0, 1, 1], [], []>} : vector<1x16xf32>, vector<16x1xf32>, vector<1x1xf32> -> vector<1x1xf32>
    %cst_37 = arith.constant 0.000000e+00 : f32
    %73 = vector.broadcast %cst_37 : f32 to vector<1x1xf32>
    %74 = arith.maximumf %72, %73 : vector<1x1xf32>
    %75 = arith.mulf %74, %67 : vector<1x1xf32>
    %76 = arith.addf %75, %68 : vector<1x1xf32>
    %c0_38 = arith.constant 0 : index
    %c0_39 = arith.constant 0 : index
    %77 = vector.load %arg6[%c0_38, %c0_39] : memref<16x1xf32, #tpu.memory_space<vmem>>, vector<16x1xf32>
    %cst_40 = arith.constant dense<0.000000e+00> : vector<16x1xf32>
    %78 = tpu.matmul %77, %76, %cst_40 {dimension_numbers = #tpu.dot_dimension_numbers<[1], [0], [0], [1], [0, 0, 1, 1], [], []>} : vector<16x1xf32>, vector<1x1xf32>, vector<16x1xf32> -> vector<16x1xf32>
    %cst_41 = arith.constant 0.000000e+00 : f32
    %79 = vector.broadcast %cst_41 : f32 to vector<16x1xf32>
    %80 = arith.maximumf %78, %79 : vector<16x1xf32>
    %81 = arith.mulf %80, %69 : vector<16x1xf32>
    %82 = arith.addf %81, %70 : vector<16x1xf32>
    %c0_42 = arith.constant 0 : index
    %c4 = arith.constant 4 : index
    %83 = vector.load %arg8[%c0_42, %c4] : memref<17x8xf32, #tpu.memory_space<vmem>>, vector<4x1xf32>
    %c0_43 = arith.constant 0 : index
    %c5 = arith.constant 5 : index
    %84 = vector.load %arg8[%c0_43, %c5] : memref<17x8xf32, #tpu.memory_space<vmem>>, vector<4x1xf32>
    %c0_44 = arith.constant 0 : index
    %c6 = arith.constant 6 : index
    %85 = vector.load %arg8[%c0_44, %c6] : memref<17x8xf32, #tpu.memory_space<vmem>>, vector<4x1xf32>
    %c0_45 = arith.constant 0 : index
    %c7 = arith.constant 7 : index
    %86 = vector.load %arg8[%c0_45, %c7] : memref<17x8xf32, #tpu.memory_space<vmem>>, vector<4x1xf32>
    %c0_46 = arith.constant 0 : index
    %c0_47 = arith.constant 0 : index
    %87 = vector.load %arg7[%c0_46, %c0_47] : memref<8x4xf32, #tpu.memory_space<vmem>>, vector<4x4xf32>
    %cst_48 = arith.constant dense<0.000000e+00> : vector<4x1xf32>
    %88 = tpu.matmul %87, %10, %cst_48 {dimension_numbers = #tpu.dot_dimension_numbers<[1], [0], [0], [1], [0, 0, 1, 1], [], []>} : vector<4x4xf32>, vector<4x1xf32>, vector<4x1xf32> -> vector<4x1xf32>
    %cst_49 = arith.constant 0.000000e+00 : f32
    %89 = vector.broadcast %cst_49 : f32 to vector<4x1xf32>
    %90 = arith.maximumf %88, %89 : vector<4x1xf32>
    %91 = arith.mulf %90, %83 : vector<4x1xf32>
    %92 = arith.addf %91, %84 : vector<4x1xf32>
    %c4_50 = arith.constant 4 : index
    %c0_51 = arith.constant 0 : index
    %93 = vector.load %arg7[%c4_50, %c0_51] : memref<8x4xf32, #tpu.memory_space<vmem>>, vector<4x4xf32>
    %cst_52 = arith.constant dense<0.000000e+00> : vector<4x1xf32>
    %94 = tpu.matmul %93, %92, %cst_52 {dimension_numbers = #tpu.dot_dimension_numbers<[1], [0], [0], [1], [0, 0, 1, 1], [], []>} : vector<4x4xf32>, vector<4x1xf32>, vector<4x1xf32> -> vector<4x1xf32>
    %cst_53 = arith.constant 0.000000e+00 : f32
    %95 = vector.broadcast %cst_53 : f32 to vector<4x1xf32>
    %96 = arith.maximumf %94, %95 : vector<4x1xf32>
    %97 = arith.mulf %96, %85 : vector<4x1xf32>
    %98 = arith.addf %97, %86 : vector<4x1xf32>
    %c0_54 = arith.constant 0 : index
    %c0_55 = arith.constant 0 : index
    %99 = vector.load %arg9[%c0_54, %c0_55] : memref<64x20xf32, #tpu.memory_space<vmem>>, vector<64x16xf32>
    %cst_56 = arith.constant dense<0.000000e+00> : vector<64x1xf32>
    %100 = tpu.matmul %99, %82, %cst_56 {dimension_numbers = #tpu.dot_dimension_numbers<[1], [0], [0], [1], [0, 0, 1, 1], [], []>} : vector<64x16xf32>, vector<16x1xf32>, vector<64x1xf32> -> vector<64x1xf32>
    %c0_57 = arith.constant 0 : index
    %c16_58 = arith.constant 16 : index
    %101 = vector.load %arg9[%c0_57, %c16_58] : memref<64x20xf32, #tpu.memory_space<vmem>>, vector<64x4xf32>
    %cst_59 = arith.constant dense<0.000000e+00> : vector<64x1xf32>
    %102 = tpu.matmul %101, %98, %cst_59 {dimension_numbers = #tpu.dot_dimension_numbers<[1], [0], [0], [1], [0, 0, 1, 1], [], []>} : vector<64x4xf32>, vector<4x1xf32>, vector<64x1xf32> -> vector<64x1xf32>
    %103 = arith.mulf %100, %102 : vector<64x1xf32>
    %104 = vector.broadcast %103 : vector<64x1xf32> to vector<64x256xf32>
    %105 = vector.broadcast %66 : vector<1x256xf32> to vector<64x256xf32>
    %106 = arith.mulf %104, %105 : vector<64x256xf32>
    %cst_60 = arith.constant 5.000000e-01 : f32
    %107 = vector.broadcast %cst_60 : f32 to vector<64x256xf32>
    %108 = arith.mulf %107, %106 : vector<64x256xf32>
    %109 = math.tanh %108 : vector<64x256xf32>
    %cst_61 = arith.constant 5.000000e-01 : f32
    %110 = vector.broadcast %cst_61 : f32 to vector<64x256xf32>
    %111 = arith.mulf %110, %109 : vector<64x256xf32>
    %cst_62 = arith.constant 1.000000e+00 : f32
    %112 = vector.broadcast %cst_62 : f32 to vector<64x256xf32>
    %113 = arith.addf %112, %111 : vector<64x256xf32>
    %114 = arith.mulf %1, %113 : vector<64x256xf32>
    %115 = vector.shape_cast %114 : vector<64x256xf32> to vector<1x64x256xf32>
    %c0_63 = arith.constant 0 : index
    %c0_64 = arith.constant 0 : index
    %c0_65 = arith.constant 0 : index
    %116 = vector.load %arg10[%c0_63, %c0_64, %c0_65] : memref<1x64x256xf32, #tpu.memory_space<vmem>>, vector<1x64x256xf32>
    tpu.vector_store %arg10[%c0_63, %c0_64, %c0_65], %115 {strides = array<i32>} : memref<1x64x256xf32, #tpu.memory_space<vmem>>, vector<1x64x256xf32>,
    return
  }
  func.func @transform_0(%arg0: i32) -> (i32, i32, i32) {
    %c0_i32 = arith.constant 0 : i32
    %c0_i32_0 = arith.constant 0 : i32
    %c0_i32_1 = arith.constant 0 : i32
    return %arg0, %c0_i32, %c0_i32_0 : i32, i32, i32
  }
  func.func @transform_1(%arg0: i32) -> (i32, i32) {
    %c0_i32 = arith.constant 0 : i32
    %c0_i32_0 = arith.constant 0 : i32
    %c0_i32_1 = arith.constant 0 : i32
    return %c0_i32, %c0_i32_0 : i32, i32
  }
  func.func @transform_2(%arg0: i32) -> (i32, i32) {
    %c0_i32 = arith.constant 0 : i32
    %c0_i32_0 = arith.constant 0 : i32
    %c0_i32_1 = arith.constant 0 : i32
    return %c0_i32, %c0_i32_0 : i32, i32
  }
  func.func @transform_3(%arg0: i32) -> (i32, i32) {
    %c0_i32 = arith.constant 0 : i32
    %c0_i32_0 = arith.constant 0 : i32
    %c0_i32_1 = arith.constant 0 : i32
    return %c0_i32, %c0_i32_0 : i32, i32
  }
  func.func @transform_4(%arg0: i32) -> (i32, i32) {
    %c0_i32 = arith.constant 0 : i32
    %c0_i32_0 = arith.constant 0 : i32
    %c0_i32_1 = arith.constant 0 : i32
    return %c0_i32, %c0_i32_0 : i32, i32
  }
  func.func @transform_5(%arg0: i32) -> (i32, i32) {
    %c0_i32 = arith.constant 0 : i32
    %c0_i32_0 = arith.constant 0 : i32
    %c0_i32_1 = arith.constant 0 : i32
    return %c0_i32, %c0_i32_0 : i32, i32
  }
  func.func @transform_6(%arg0: i32) -> (i32, i32) {
    %c0_i32 = arith.constant 0 : i32
    %c0_i32_0 = arith.constant 0 : i32
    %c0_i32_1 = arith.constant 0 : i32
    return %c0_i32, %c0_i32_0 : i32, i32
  }
  func.func @transform_7(%arg0: i32) -> (i32, i32) {
    %c0_i32 = arith.constant 0 : i32
    %c0_i32_0 = arith.constant 0 : i32
    %c0_i32_1 = arith.constant 0 : i32
    return %c0_i32, %c0_i32_0 : i32, i32
  }
  func.func @transform_8(%arg0: i32) -> (i32, i32) {
    %c0_i32 = arith.constant 0 : i32
    %c0_i32_0 = arith.constant 0 : i32
    %c0_i32_1 = arith.constant 0 : i32
    return %c0_i32, %c0_i32_0 : i32, i32
  }
  func.func @transform_9(%arg0: i32) -> (i32, i32, i32) {
    %c0_i32 = arith.constant 0 : i32
    %c0_i32_0 = arith.constant 0 : i32
    %c0_i32_1 = arith.constant 0 : i32
    return %arg0, %c0_i32, %c0_i32_0 : i32, i32, i32
  }
}

</mosaic_0001>

<bundles_post_ra>
// kernel: ral_forward.1
= control target key start
LH: loop header
LB: loop body
LE: loop exit
PB: predicated region body
PF: predicated region fallthrough
CT: control target
= control target key end

     0   :  { %s1385_s30 = smov 0   ;;  %s1744_s0 = inlined_call_operand.vmem [shape: f32[2,64,256], index: 0, kind: input, shape index: {}]   ;;  %s1745_s1 = inlined_call_operand.vmem [shape: f32[20,64], index: 1, kind: input, shape index: {}]   ;;  %s1746_s2 = inlined_call_operand.vmem [shape: f32[9,16], index: 2, kind: input, shape index: {}]   ;;  %s1747_s3 = inlined_call_operand.vmem [shape: f32[9,256], index: 3, kind: input, shape index: {}]   ;;  %s1748_s4 = inlined_call_operand.vmem [shape: f32[1,16], index: 4, kind: input, shape index: {}]   ;;  %s1749_s5 = inlined_call_operand.vmem [shape: f32[16,1], index: 5, kind: input, shape index: {}]   ;;  %s1750_s6 = inlined_call_operand.vmem [shape: f32[8,4], index: 6, kind: input, shape index: {}]   ;;  %s1751_s7 = inlined_call_operand.vmem [shape: f32[17,8], index: 7, kind: input, shape index: {}]   ;;  %s1752_s8 = inlined_call_operand.vmem [shape: f32[64,20], index: 8, kind: input, shape index: {}]   ;;  %s1753_s9 = inlined_call_operand.vmem [shape: f32[2,64,256], index: 9, kind: output, shape index: {}]  }
   0x1 LB: > { %s1187_s10 = sadd.s32 4294967295, %s1314_s30   ;;  %p1191_p0 = scmp.ge.s32.totalorder %s1314_s30, 1  ;;  %s1314_s30 = sphi %s1385_s30, %s19_s30  }
   0x2   : > { %p287_p1 = scmp.lt.s32.totalorder %s1314_s30, 3 }
   0x4   : > { %p288_p2 = pnand %p1191_p0, %p287_p1 }
   0x5   : > { %p323_p3 = scmp.lt.s32.totalorder (!%p288_p2), %s1187_s10, 1  ;;  %s1317_s27 = smov (!%p288_p2), 124  }
   0x6   : > { %291 = sbr.rel (%p288_p2) target bundleno = 921 (0x399), region = 56  ;;  %s1318_s28 = smov (!%p288_p2), 123  }
   0x7   : > { %s1319_s29 = smov (!%p288_p2), 122   ;;  %s1320_s19 = smov (!%p288_p2), 127  }
   0x8   : > { %s1321_s20 = smov (!%p288_p2), 112   ;;  %s1322_s21 = smov (!%p288_p2), 126  }
   0x9   : > { %s1323_s24 = smov (!%p288_p2), 125   ;;  %s1324_s25 = smov (!%p288_p2), 121  }
   0xa   : > { %s1325_s26 = smov (!%p288_p2), 17   ;;  %s1327_s12 = smov (!%p288_p2), 1  }
   0xb   : > { %s1755_s10 = smov (!%p323_p3, %s1187_s10), 1  ;;  %v349_v8 = vld [vmem:[%s1745_s1] sm:$0xff]  ;;  %vm352_vm0 = vcmask 523264   ;;  %v350_v13 = vld [vmem:[%s1745_s1 + $0x8] sm:$0xff]  ;;  %v351_v18 = vld [vmem:[%s1745_s1 + $0x10] sm:$0xf] }
   0xc   : > { %s1233_s11 = sshll.u32 %s1755_s10, 7  ;;  %v436_v21 = vld [vmem:[%s1746_s2] sm:$0xff]  ;;  %vm438_vm1 = vcmask 130048   ;;  %v437_v22 = vld [vmem:[%s1746_s2 + $0x8] sm:$0x1]  ;;  %vm420_vm2 = vcmask 1043456  }
   0xd   : > { %s1401_s14 = scalar_lea.vmem %s1744_s0, %s1233_s11  ;;  %v1316_v32 = vmov 256.0   ;;  %v746_v36 = vld [vmem:[%s1751_s7] sm:$0xf]  ;;  %v1502_v40 = vld [vmem:[%s1752_s8 + $0x10] sm:$0xff]  ;;  %v660_v41 = vld [vmem:[%s1751_s7 + $0x8] sm:$0xff]  ;;  %vm748_vm4 = vcmask 31744   ;;  %s1693_s18 = scalar_lea.vmem %s1753_s9, %s1233_s11 }
   0xe   : > { %v347_v0 = vld [vmem:[%s1401_s14 + $0x70] sm:$0xff]  ;;  %v1405_v1 = vld [vmem:[%s1401_s14 + $0x60] sm:$0xff]  ;;  %v1435_v9 = vld [vmem:[%s1401_s14 + $0x78] sm:$0xff]  ;;  %1273 = vrcp.f32 %v1316_v32  ;;  %781 = vrot.lane.b32.xlu2 %v746_v36, %s1318_s28  ;;  %s1328_s15 = smov 111   ;;  %s1329_s16 = smov 113   ;;  %vm584_vm5 = vcmask 1040384  }
   0xf   : > { %370 = vmatpush.msra.mxu1 %v347_v0  ;;  %v1408_v2 = vld [vmem:[%s1401_s14 + $0x50] sm:$0xff]  ;;  %v1412_v3 = vld [vmem:[%s1401_s14 + $0x40] sm:$0xff]  ;;  %v1440_v10 = vld [vmem:[%s1401_s14 + $0x68] sm:$0xff]  ;;  %s1330_s17 = smov 15   ;;  %vm527_vm6 = vcmask 7168   ;;  %vm517_vm7 = vcmask 121856  }
  0x10   : > { %v1416_v4 = vld [vmem:[%s1401_s14 + $0x30] sm:$0xff]  ;;  %v1420_v5 = vld [vmem:[%s1401_s14 + $0x20] sm:$0xff]  ;;  %v1444_v11 = vld [vmem:[%s1401_s14 + $0x58] sm:$0xff]  ;;  %vm497_vm8 = vcmask 138240   ;;  %vm587_vm9 = vcmask 1041408   ;;  %vm590_vm10 = vcmask 1042432  }
  0x11   : > { %371 = vmatpush.msra.mxu1 %v1405_v1  ;;  %v1424_v6 = vld [vmem:[%s1401_s14 + $0x10] sm:$0xff]  ;;  %v1428_v7 = vld [vmem:[%s1401_s14] sm:$0xff]  ;;  %v1448_v12 = vld [vmem:[%s1401_s14 + $0x48] sm:$0xff]  ;;  %vm535_vm11 = vcmask 1039360   ;;  %vm544_vm12 = vcmask 924672   ;;  %vm595_vm13 = vcmask 1044480  }
  0x12   : > { %v1455_v14 = vld [vmem:[%s1401_s14 + $0x38] sm:$0xff]  ;;  %v1460_v15 = vld [vmem:[%s1401_s14 + $0x28] sm:$0xff]  ;;  %v1497_v39 = vld [vmem:[%s1751_s7] sm:$0x1]  ;;  %vm598_vm14 = vcmask 1045504   ;;  %vm553_vm15 = vcmask 916480  }
  0x13   : > { %372 = vmatpush.msra.mxu1 %v1408_v2  ;;  %v1464_v16 = vld [vmem:[%s1401_s14 + $0x18] sm:$0xff]  ;;  %v1468_v17 = vld [vmem:[%s1401_s14 + $0x8] sm:$0xff]  ;;  %v659_v45 = vld [vmem:[%s1751_s7] sm:$0xff] }
  0x14   : > { %v1274_v33 = vpop.eup %1273  ;;  %v661_v49 = vld [vmem:[%s1748_s4] sm:$0x1]  ;;  %v1526_v52 = vld [vmem:[%s1752_s8 + $0x28] sm:$0xff]  ;;  %v1547_v55 = vld [vmem:[%s1752_s8 + $0x38] sm:$0xff] }
  0x15   : > { %373 = vmatpush.msra.mxu1 %v1412_v3  ;;  %v427_v34 = vmul.f32 256.0, %v1274_v33  ;;  %vm431_vm3 = vweird.f32 %v1274_v33  ;;  %v1521_v51 = vld [vmem:[%s1752_s8 + $0x20] sm:$0xff]  ;;  %v1554_v57 = vld [vmem:[%s1752_s8 + $0x8] sm:$0xff]  ;;  %v1573_v60 = vld [vmem:[%s1752_s8 + $0x18] sm:$0xff] }
  0x16   : > { %688 = vrot.lane.b32.xlu2 %v1497_v39, %s1320_s19  ;;  %v1531_v53 = vld [vmem:[%s1752_s8] sm:$0xff]  ;;  %v1583_v63 = vld [vmem:[%s1752_s8 + $0x30] sm:$0xff] }
  0x17   : > { %374 = vmatpush.msra.mxu1 %v1416_v4  ;;  %v428_v35 = vsub.f32 1.0, %v427_v34  ;;  %v747_v54 = vld [vmem:[%s1750_s6] sm:$0xf] }
  0x19   : > { %375 = vmatpush.msra.mxu1 %v1420_v5  ;;  %v429_v37 = vmul.f32 %v1274_v33, %v428_v35 }
  0x1b   : > { %376 = vmatpush.msra.mxu1 %v1424_v6  ;;  %v430_v38 = vadd.f32 %v1274_v33, %v429_v37  ;;  %v693_v37 = vld [vmem:[%s1749_s5 + $0x8] sm:$0xff] }
  0x1d   : > { %377 = vmatpush.msra.mxu1 %v1428_v7  ;;  %v432_v42 = vsel %vm431_vm3, %v1274_v33, %v430_v38  ;;  %v785_v38 = vld [vmem:[%s1750_s6 + $0x4] sm:$0xf] }
  0x1e   : > { %1196 = vmatmul.msk.f32.vlgmr.msra.gmra.mxu1 %vm352_vm0, %v349_v8  ;;  %817 = vrot.lane.b32.xlu2 %v746_v36, %s1324_s25 }
  0x1f   : > { %396 = vmatpush.msrb.mxu1 %v1435_v9 }
  0x21   : > { %397 = vmatpush.msrb.mxu1 %v1440_v10 }
  0x23   : > { %398 = vmatpush.msrb.mxu1 %v1444_v11 }
  0x25   : > { %399 = vmatpush.msrb.mxu1 %v1448_v12 }
  0x26   : > { %1197 = vmatmul.msk.f32.gmra.mxu1 %vm352_vm0, %v350_v13  ;;  %894 = vrot.lane.b32.xlu2 %v1531_v53, %s1321_s20 }
  0x27   : > { %400 = vmatpush.msrb.mxu1 %v1455_v14 }
  0x29   : > { %401 = vmatpush.msrb.mxu1 %v1460_v15 }
  0x2b   : > { %402 = vmatpush.msrb.mxu1 %v1464_v16 }
  0x2d   : > { %403 = vmatpush.msrb.mxu1 %v1468_v17 }
  0x2e   : > { %1198 = vmatmul.msk.f32.gmra.mxu1 %vm352_vm0, %v351_v18  ;;  %896 = vrot.lane.b32.xlu2 %v1554_v57, %s1321_s20 }
  0x36   : > { %1199 = vmatmul.msk.f32.vlgmr.msrb.gmra.mxu1 %vm352_vm0, %v349_v8  ;;  %730 = vrot.lane.b32.xlu2 %v659_v45, %s1322_s21 }
  0x3e   : > { %1200 = vmatmul.msk.f32.gmra.mxu1 %vm352_vm0, %v350_v13  ;;  %900 = vrot.lane.b32.xlu2 %v1573_v60, %s1321_s20 }
  0x46   : > { %1201 = vmatmul.msk.f32.gmra.mxu1 %vm352_vm0, %v351_v18  ;;  %906 = vrot.lane.b32.xlu2 %v1583_v63, %s1321_s20  ;;  %vm564_vm0 = vcmask 908288  }
  0x9b   : > { %v379_v19 = vpop.f32.mrf.mxu1 }
  0xa3   : > { %v382_v20 = vpop.f32.mrf.mxu1 }
  0xa4   : > { %459 = vmatpush.msra.mxu1 %v382_v20  ;;  %1235 = vmatpush.msra.mxu2 %v382_v20 }
  0xa6   : > { %460 = vmatpush.msra.mxu1 %v379_v19  ;;  %1236 = vmatpush.msra.mxu2 %v379_v19 }
  0xa7   : > { %1202 = vmatmul.msk.f32.vlgmr.msra.gmra.mxu1 %vm438_vm1, %v436_v21  ;;  %1203 = vmatmul.msk.f32.vlgmr.msra.gmra.mxu2 %vm438_vm1, %v437_v22 }
  0xab   : > { %v385_v23 = vpop.f32.mrf.mxu1 }
  0xac   : > { %v421_v28 = vsel %vm420_vm2, %v385_v23, 0.0  ;;  %v1333_v23 = vmov 0  }
  0xad   : > { %1266 = vset.pattern.permute.xlu2 %v1333_v23 }
  0xb3   : > { %v405_v24 = vpop.f32.mrf.mxu1 }
  0xb4   : > { %v414_v30 = vadd.f32 %v405_v24, %v379_v19  ;;  %v1331_v19 = vmov 1  }
  0xb5   : > { %1267 = vset.pattern.permute.xlu1 %v1331_v19 }
  0xbb   : > { %v408_v25 = vpop.f32.mrf.mxu1 }
  0xbc   : > { %482 = vmatpush.msra.mxu3 %v408_v25  ;;  %v417_v26 = vadd.f32 %v408_v25, %v382_v20  ;;  %v628_v20 = vld [vmem:[%s1751_s7 + $0x10] sm:$0x1] }
  0xbe   : > { %483 = vmatpush.msra.mxu3 %v405_v24  ;;  %418 = vadd.xlane.f32.xlu0 %v417_v26  ;;  %v782_v24 = vpop.permute.xlu2 %781 }
  0xbf   : > { %1204 = vmatmul.msk.f32.vlgmr.msra.gmra.mxu3 %vm438_vm1, %v436_v21  ;;  %v1332_v21 = vmov 2  }
  0xc0   : > { %1268 = vset.pattern.permute.xlu0 %v1332_v21 }
  0xc3   : > { %v411_v27 = vpop.f32.mrf.mxu1 }
  0xc4   : > { %v422_v29 = vsel %vm420_vm2, %v411_v27, 0.0 }
  0xc5   : > { %v423_v31 = vadd.f32 %v422_v29, %v421_v28  ;;  %v1334_v28 = vmov 3  }
  0xc6   : > { %415 = vadd.xlane.f32.xlu0 %v414_v30  ;;  %v689_v27 = vpop.permute.xlu2 %688 }
  0xc7   : > { %424 = vadd.xlane.f32.xlu1 %v423_v31  ;;  %1205 = vmatmul.msk.f32.gmra.mxu3 %vm438_vm1, %v437_v22  ;;  %v692_v31 = vld [vmem:[%s1749_s5] sm:$0xff] }
  0xda   : > { %813 = vrot.lane.b32.xlu0 %v746_v36, %s1319_s29  ;;  %s1326_s29 = smov 16  }
  0xe0   : > { %777 = vrot.lane.b32.xlu1 %v746_v36, %s1317_s27 }
  0xe2   : > { %732 = vrot.lane.b32.xlu0 %v660_v41, %s1322_s21 }
  0xe8   : > { %898 = vrot.lane.b32.xlu1 %v1502_v40, %s1321_s20 }
  0xea   : > { %738 = vrot.lane.b32.xlu0 %v659_v45, %s1323_s24 }
  0xf0   : > { %740 = vrot.lane.b32.xlu1 %v660_v41, %s1323_s24 }
  0xf2   : > { %904 = vrot.lane.b32.xlu0 %v1526_v52, %s1321_s20 }
  0xf8   : > { %902 = vrot.lane.b32.xlu1 %v1521_v51, %s1321_s20 }
 0x100   : > { %908 = vrot.lane.b32.xlu1 %v1547_v55, %s1321_s20 }
 0x124   : > { %v1549_v56 = vpop.f32.mrf.mxu1 }
 0x125   : > { %493 = vrot.lane.b32.xlu0 %v1549_v56, %s1325_s26  ;;  %531 = vrot.lane.b32.xlu1 %v1549_v56, %s1320_s19  ;;  %v502_v58 = vrot.slane %v1549_v56, 1  ;;  %v521_v59 = vrot.slane %v1549_v56, 3  ;;  %v511_v8 = vrot.slane %v1549_v56, 2 }
 0x126   : > { %540 = vrot.lane.b32.xlu2 %v1549_v56, %s1329_s16 }
 0x12a   : > { %v465_v61 = vpop.f32.mrf.mxu2 }
 0x12d   : > { %549 = vrot.lane.b32.xlu0 %v1549_v56, %s1321_s20  ;;  %504 = vrot.lane.b32.xlu1 %v502_v58, %s1326_s29 }
 0x12e   : > { %513 = vrot.lane.b32.xlu2 %v511_v8, %s1330_s17 }
 0x131   : > { %v419_v43 = vpop.xlane.xlu0 %418 }
 0x132   : > { %v434_v44 = vmul.f32 %v432_v42, %v419_v43 }
 0x134   : > { %679 = vmatpush.msrb.mxu2 %v434_v44 }
 0x135   : > { %523 = vrot.lane.b32.xlu0 %v521_v59, %s1327_s12  ;;  %560 = vrot.lane.b32.xlu1 %v465_v61, %s1328_s15 }
 0x139   : > { %v416_v46 = vpop.xlane.xlu0 %415 }
 0x13a   : > { %v433_v47 = vmul.f32 %v432_v42, %v416_v46  ;;  %v425_v48 = vpop.xlane.xlu1 %424 }
 0x13b   : > { %v435_v50 = vmul.f32 %v432_v42, %v425_v48 }
 0x13c   : > { %680 = vmatpush.msrb.mxu2 %v433_v47 }
 0x13d   : > { %1206 = vmatmul.msk.f32.vlgmr.msrb.gmra.mxu2 %vm438_vm1, %v661_v49 }
 0x13e   : > { %1210 = vmatpush.msk.msra.mxu2 %vm420_vm2, %v435_v50 }
 0x142   : > { %v1578_v62 = vpop.f32.mrf.mxu3 }
 0x143   : > { %533 = vrot.lane.b32.xlu0 %v1578_v62, %s1320_s19  ;;  %v503_v0 = vrot.slane %v1578_v62, 1  ;;  %542 = vrot.lane.b32.xlu1 %v1578_v62, %s1329_s16  ;;  %v512_v18 = vrot.slane %v1578_v62, 2  ;;  %v522_v22 = vrot.slane %v1578_v62, 3 }
 0x144   : > { %495 = vrot.lane.b32.xlu2 %v1578_v62, %s1325_s26 }
 0x145   : > { %1211 = vmatmul.msk.f32.vlgmr.msra.gmra.mxu2 %vm748_vm4, %v747_v54 }
 0x14a   : > { %v488_v13 = vpop.f32.mrf.mxu3 }
 0x14b   : > { %506 = vrot.lane.b32.xlu0 %v503_v0, %s1326_s29  ;;  %515 = vrot.lane.b32.xlu1 %v512_v18, %s1330_s17 }
 0x14c   : > { %551 = vrot.lane.b32.xlu2 %v1578_v62, %s1321_s20  ;;  %v814_v42 = vpop.permute.xlu0 %813 }
 0x152   : > { %v778_v33 = vpop.permute.xlu1 %777 }
 0x153   : > { %562 = vrot.lane.b32.xlu0 %v488_v13, %s1328_s15  ;;  %639 = vperm.xlu1 %1267, %v628_v20  }
 0x154   : > { %525 = vrot.lane.b32.xlu2 %v522_v22, %s1327_s12  ;;  %v733_v45 = vpop.permute.xlu0 %732 }
 0x15a   : > { %v899_v46 = vpop.permute.xlu1 %898 }
 0x15b   : > { %647 = vperm.xlu0 %1268, %v628_v20   ;;  %1270 = vset.pattern.permute.xlu1 %v1333_v23 }
 0x15c   : > { %633 = vperm.xlu2 %1266, %v628_v20   ;;  %v739_v8 = vpop.permute.xlu0 %738 }
 0x162   : > { %v741_v13 = vpop.permute.xlu1 %740 }
 0x163   : > { %1272 = vset.pattern.permute.xlu0 %v1333_v23 }
 0x164   : > { %1269 = vset.pattern.permute.xlu2 %v1334_v28 }
 0x165   : > { %653 = vperm.xlu2 %1269, %v628_v20  }
 0x16d   : > { %1271 = vset.pattern.permute.xlu2 %v1333_v23 }
 0x1c0   : > { %v682_v25 = vpop.f32.mrf.mxu2 }
 0x1c1   : > { %v685_v26 = vmax.f32 %v682_v25, 0.0 }
 0x1c3   : > { %v686_v29 = vmul.f32 %v685_v26, %v1497_v39  ;;  %v818_v39 = vpop.permute.xlu2 %817 }
 0x1c5   : > { %v691_v30 = vadd.f32 %v689_v27, %v686_v29 }
 0x1c7   : > { %1207 = vmatpush.msk.msrb.mxu3 %vm584_vm5, %v691_v30 }
 0x1c8   : > { %1208 = vmatmul.msk.f32.vlgmr.msrb.gmra.mxu3 %vm527_vm6, %v692_v31  ;;  %v772_v32 = vpop.f32.mrf.mxu2 }
 0x1c9   : > { %v775_v34 = vmax.f32 %v772_v32, 0.0 }
 0x1cb   : > { %v780_v35 = vmul.f32 %v778_v33, %v775_v34  ;;  %v895_v41 = vpop.permute.xlu2 %894 }
 0x1cd   : > { %v784_v36 = vadd.f32 %v782_v24, %v780_v35 }
 0x1cf   : > { %1212 = vmatpush.msk.msrb.mxu2 %vm420_vm2, %v784_v36 }
 0x1d0   : > { %1209 = vmatmul.msk.f32.gmra.mxu3 %vm527_vm6, %v693_v37  ;;  %1213 = vmatmul.msk.f32.vlgmr.msrb.gmra.mxu2 %vm748_vm4, %v785_v38 }
 0x1d3   : > { %v897_v43 = vpop.permute.xlu2 %896 }
 0x1db   : > { %v731_v48 = vpop.permute.xlu2 %730 }
 0x24b   : > { %v720_v44 = vpop.f32.mrf.mxu3 }
 0x24c   : > { %v726_v47 = vmax.f32 %v720_v44, 0.0 }
 0x24e   : > { %v736_v54 = vmul.f32 %v731_v48, %v726_v47 }
 0x250   : > { %v744_v20 = vadd.f32 %v739_v8, %v736_v54 }
 0x253   : > { %v723_v49 = vpop.f32.mrf.mxu3  ;;  %v809_v50 = vpop.f32.mrf.mxu2 }
 0x254   : > { %v727_v58 = vmax.f32 %v723_v49, 0.0  ;;  %v812_v59 = vmax.f32 %v809_v50, 0.0 }
 0x256   : > { %v737_v61 = vmul.f32 %v733_v45, %v727_v58  ;;  %v816_v0 = vmul.f32 %v814_v42, %v812_v59 }
 0x258   : > { %v745_v18 = vadd.f32 %v741_v13, %v737_v61  ;;  %v820_v19 = vadd.f32 %v818_v39, %v816_v0 }
 0x25a   : > { %867 = vmatpush.msra.mxu2 %v745_v18  ;;  %1222 = vmatpush.msk.msra.mxu0 %vm420_vm2, %v820_v19 }
 0x25b   : > { %1223 = vmatmul.msk.f32.vlgmr.msra.gmra.mxu0 %vm748_vm4, %v895_v41  ;;  %1237 = vmatpush.msra.mxu3 %v745_v18 }
 0x25c   : > { %868 = vmatpush.msra.mxu2 %v744_v20 }
 0x25d   : > { %1214 = vmatmul.msk.f32.vlgmr.msra.gmra.mxu2 %vm438_vm1, %v1531_v53  ;;  %1238 = vmatpush.msra.mxu3 %v744_v20  ;;  %v901_v53 = vpop.permute.xlu2 %900 }
 0x25e   : > { %1218 = vmatmul.msk.f32.vlgmr.msra.gmra.mxu3 %vm438_vm1, %v1521_v51  ;;  %v903_v51 = vpop.permute.xlu1 %902 }
 0x263   : > { %1224 = vmatmul.msk.f32.gmra.mxu0 %vm748_vm4, %v897_v43 }
 0x265   : > { %1215 = vmatmul.msk.f32.gmra.mxu2 %vm438_vm1, %v1554_v57  ;;  %v907_v57 = vpop.permute.xlu2 %906 }
 0x266   : > { %1219 = vmatmul.msk.f32.gmra.mxu3 %vm438_vm1, %v1526_v52  ;;  %v905_v52 = vpop.permute.xlu0 %904 }
 0x26b   : > { %1225 = vmatmul.msk.f32.gmra.mxu0 %vm748_vm4, %v899_v46 }
 0x26d   : > { %1216 = vmatmul.msk.f32.gmra.mxu2 %vm438_vm1, %v1502_v40  ;;  %v909_v40 = vpop.permute.xlu1 %908  ;;  %v1643_v22 = vpop.permute.xlu2 %540 }
 0x26e   : > { %1220 = vmatmul.msk.f32.gmra.mxu3 %vm438_vm1, %v1583_v63  ;;  %v494_v63 = vpop.permute.xlu0 %493 }
 0x26f   : > { %v501_v48 = vsel %vm497_vm8, 0.0, %v494_v63 }
 0x273   : > { %1226 = vmatmul.msk.f32.gmra.mxu0 %vm748_vm4, %v901_v53 }
 0x275   : > { %1217 = vmatmul.msk.f32.gmra.mxu2 %vm438_vm1, %v1573_v60  ;;  %v532_v21 = vpop.permute.xlu1 %531  ;;  %v514_v24 = vpop.permute.xlu2 %513 }
 0x276   : > { %1221 = vmatmul.msk.f32.gmra.mxu3 %vm438_vm1, %v1547_v55  ;;  %v1645_v60 = vpop.permute.xlu0 %549  ;;  %v520_v46 = vsel %vm517_vm7, 0.0, %v514_v24 }
 0x277   : > { %v575_v59 = vrot.slane %v520_v46, 6 }
 0x27b   : > { %1227 = vmatmul.msk.f32.gmra.mxu0 %vm748_vm4, %v903_v51 }
 0x27d   : > { %v505_v23 = vpop.permute.xlu1 %504  ;;  %v496_v30 = vpop.permute.xlu2 %495 }
 0x27e   : > { %v524_v25 = vpop.permute.xlu0 %523  ;;  %v510_v37 = vsel %vm438_vm1, 0.0, %v505_v23  ;;  %v498_v54 = vsel %vm497_vm8, %v494_v63, %v496_v30 }
 0x27f   : > { %v570_v45 = vrot.slane %v510_v37, 7  ;;  %v530_v58 = vsel %vm527_vm6, 0.0, %v524_v25 }
 0x280   : > { %v580_v19 = vrot.slane %v530_v58, 5 }
 0x281   : > { %v585_v0 = vsel %vm584_vm5, %v501_v48, %v570_v45  ;;  %v605_v48 = vld [vmem:[%s1747_s3 + $0x8] sm:$0xff] }
 0x282   : > { %v588_v51 = vsel %vm587_vm9, %v585_v0, %v575_v59 }
 0x283   : > { %1228 = vmatmul.msk.f32.gmra.mxu0 %vm748_vm4, %v905_v52 }
 0x285   : > { %v1647_v26 = vpop.permute.xlu1 %560  ;;  %v1649_v36 = vpop.permute.xlu2 %551 }
 0x286   : > { %v534_v31 = vpop.permute.xlu0 %533 }
 0x28b   : > { %1229 = vmatmul.msk.f32.gmra.mxu0 %vm748_vm4, %v907_v57 }
 0x28d   : > { %v543_v35 = vpop.permute.xlu1 %542  ;;  %v526_v61 = vpop.permute.xlu2 %525 }
 0x28e   : > { %v507_v38 = vpop.permute.xlu0 %506  ;;  %v528_v8 = vsel %vm527_vm6, %v524_v25, %v526_v61  ;;  %v548_v37 = vsel %vm544_vm12, %v543_v35, 0.0 }
 0x28f   : > { %v508_v41 = vsel %vm438_vm1, %v505_v23, %v507_v38  ;;  %v581_v52 = vrot.slane %v528_v8, 5  ;;  %vm601_vm1 = vcmask 1046528  }
 0x290   : > { %v571_v49 = vrot.slane %v508_v41, 7 }
 0x292   : > { %v586_v18 = vsel %vm584_vm5, %v498_v54, %v571_v49 }
 0x293   : > { %1230 = vmatmul.msk.f32.gmra.mxu0 %vm748_vm4, %v909_v40 }
 0x295   : > { %v516_v47 = vpop.permute.xlu1 %515 }
 0x296   : > { %v518_v50 = vsel %vm517_vm7, %v514_v24, %v516_v47  ;;  %v563_v38 = vpop.permute.xlu0 %562 }
 0x297   : > { %v576_v13 = vrot.slane %v518_v50, 6  ;;  %v568_v41 = vsel %vm564_vm0, %v563_v38, 0.0 }
 0x299   : > { %v589_v63 = vsel %vm587_vm9, %v586_v18, %v576_v13 }
 0x29a   : > { %v592_v24 = vsel %vm590_vm10, %v589_v63, %v581_v52 }
 0x2d8   : > { %v946_v55 = vpop.f32.mrf.mxu0 }
 0x2e0   : > { %v870_v27 = vpop.f32.mrf.mxu2  ;;  %v949_v28 = vpop.f32.mrf.mxu0 }
 0x2e1   : > { %v970_v29 = vmul.f32 %v946_v55, %v870_v27  ;;  %v882_v39 = vpop.f32.mrf.mxu3  ;;  %v591_v55 = vsel %vm590_vm10, %v588_v51, %v580_v19  ;;  %v536_v27 = vsel %vm535_vm11, %v532_v21, %v534_v31 }
 0x2e2   : > { %v593_v25 = vsel %vm420_vm2, %v591_v55, %v1549_v56 }
 0x2e3   : > { %980 = vperm.xlu1 %1270, %v970_v29   ;;  %v594_v29 = vsel %vm420_vm2, %v592_v24, %v1578_v62  ;;  %v606_v62 = vld [vmem:[%s1747_s3 + $0x10] sm:$0x1] }
 0x2e8   : > { %v873_v32 = vpop.f32.mrf.mxu2  ;;  %v952_v33 = vpop.f32.mrf.mxu0 }
 0x2e9   : > { %v971_v34 = vmul.f32 %v949_v28, %v873_v32  ;;  %v885_v23 = vpop.f32.mrf.mxu3  ;;  %v539_v28 = vsel %vm535_vm11, %v534_v31, 0.0  ;;  %v554_v31 = vsel %vm553_vm15, %v1645_v60, %v1649_v36  ;;  %v604_v60 = vld [vmem:[%s1747_s3] sm:$0xff] }
 0x2ea   : > { %v597_v21 = vsel %vm595_vm13, %v594_v29, %v539_v28  ;;  %v634_v28 = vpop.permute.xlu2 %633 }
 0x2eb   : > { %985 = vperm.xlu2 %1271, %v971_v34   ;;  %v545_v34 = vsel %vm544_vm12, %v1643_v22, %v543_v35  ;;  %v607_v22 = vld [vmem:[%s1747_s3 + $0x18] sm:$0x1]  ;;  %v565_v35 = vsel %vm564_vm0, %v1647_v26, %v563_v38 }
 0x2ec   : > { %v610_v46 = vmul.f32 %v606_v62, %v565_v35  ;;  %v611_v47 = vmul.f32 %v607_v22, %v568_v41 }
 0x2ee   : > { %v620_v58 = vsel %vm584_vm5, %v611_v47, 0.0 }
 0x2f0   : > { %v876_v42 = vpop.f32.mrf.mxu2  ;;  %v955_v43 = vpop.f32.mrf.mxu0 }
 0x2f1   : > { %v972_v44 = vmul.f32 %v952_v33, %v876_v42  ;;  %v596_v33 = vsel %vm595_vm13, %v593_v25, %v536_v27  ;;  %v557_v42 = vsel %vm553_vm15, %v1649_v36, 0.0  ;;  %v612_v36 = vsel %vm584_vm5, %v610_v46, 0.0 }
 0x2f2   : > { %v599_v56 = vsel %vm598_vm14, %v596_v33, %v545_v34 }
 0x2f3   : > { %990 = vperm.xlu1 %1270, %v972_v44   ;;  %v602_v44 = vsel %vm601_vm1, %v599_v56, %v554_v31  ;;  %v654_v31 = vpop.permute.xlu2 %653 }
 0x2f4   : > { %v608_v26 = vmul.f32 %v604_v60, %v602_v44 }
 0x2f6   : > { %v613_v61 = vadd.f32 %v612_v36, %v608_v26 }
 0x2f8   : > { %v879_v20 = vpop.f32.mrf.mxu2  ;;  %v958_v53 = vpop.f32.mrf.mxu0  ;;  %v614_v18 = vrot.slane %v613_v61, 4 }
 0x2f9   : > { %v973_v57 = vmul.f32 %v955_v43, %v879_v20  ;;  %v974_v40 = vmul.f32 %v958_v53, %v882_v39  ;;  %v888_v39 = vpop.f32.mrf.mxu3  ;;  %v600_v43 = vsel %vm598_vm14, %v597_v21, %v548_v37  ;;  %v648_v21 = vpop.permute.xlu0 %647 }
 0x2fa   : > { %v603_v49 = vsel %vm601_vm1, %v600_v43, %v557_v42  ;;  %v615_v20 = vadd.f32 %v614_v18, %v613_v61 }
 0x2fb   : > { %995 = vperm.xlu0 %1272, %v973_v57   ;;  %1000 = vperm.xlu2 %1271, %v974_v40   ;;  %v609_v54 = vmul.f32 %v605_v48, %v603_v49 }
 0x2fc   : > { %v616_v51 = vrot.slane %v615_v20, 2 }
 0x2fd   : > { %v621_v0 = vadd.f32 %v620_v58, %v609_v54 }
 0x2fe   : > { %v617_v57 = vadd.f32 %v616_v51, %v615_v20 }
 0x2ff   : > { %v622_v19 = vrot.slane %v621_v0, 4 }
 0x300   : > { %v961_v30 = vpop.f32.mrf.mxu0  ;;  %v618_v63 = vrot.slane %v617_v57, 1 }
 0x301   : > { %v975_v32 = vmul.f32 %v961_v30, %v885_v23  ;;  %v891_v59 = vpop.f32.mrf.mxu3  ;;  %v623_v53 = vadd.f32 %v622_v19, %v621_v0 }
 0x302   : > { %v619_v55 = vadd.f32 %v618_v63, %v617_v57 }
 0x303   : > { %1005 = vperm.xlu1 %1270, %v975_v32   ;;  %v624_v52 = vrot.slane %v623_v53, 2  ;;  %v640_v32 = vpop.permute.xlu1 %639 }
 0x304   : > { %v629_v27 = vmax.f32 %v619_v55, 0.0 }
 0x305   : > { %v625_v40 = vadd.f32 %v624_v52, %v623_v53 }
 0x306   : > { %v636_v29 = vmul.f32 %v634_v28, %v629_v27 }
 0x307   : > { %v626_v23 = vrot.slane %v625_v40, 1 }
 0x308   : > { %v964_v45 = vpop.f32.mrf.mxu0  ;;  %v642_v33 = vadd.f32 %v640_v32, %v636_v29 }
 0x309   : > { %v976_v50 = vmul.f32 %v964_v45, %v888_v39  ;;  %v627_v24 = vadd.f32 %v626_v23, %v625_v40 }
 0x30a   : > { %v644_v37 = vmax.f32 %v642_v33, 0.0 }
 0x30b   : > { %1010 = vperm.xlu2 %1271, %v976_v50   ;;  %v630_v25 = vmax.f32 %v627_v24, 0.0 }
 0x30c   : > { %v650_v39 = vmul.f32 %v648_v21, %v644_v37 }
 0x30d   : > { %v637_v30 = vmul.f32 %v634_v28, %v630_v25 }
 0x30e   : > { %v656_v62 = vadd.f32 %v654_v31, %v650_v39 }
 0x30f   : > { %v643_v34 = vadd.f32 %v640_v32, %v637_v30 }
 0x310   : > { %v967_v8 = vpop.f32.mrf.mxu0  ;;  %v1682_v35 = vperm.slane %v656_v62, 0 }
 0x311   : > { %v977_v13 = vmul.f32 %v967_v8, %v891_v59  ;;  %v645_v38 = vmax.f32 %v643_v34, 0.0 }
 0x313   : > { %1015 = vperm.xlu1 %1270, %v977_v13   ;;  %v651_v56 = vmul.f32 %v648_v21, %v645_v38 }
 0x315   : > { %v657_v22 = vadd.f32 %v654_v31, %v651_v56 }
 0x317   : > { %v1684_v41 = vperm.slane %v657_v22, 0 }
 0x345   : > { %v986_v42 = vpop.permute.xlu2 %985 }
 0x346   : > { %v1022_v43 = vmul.f32 %v1682_v35, %v986_v42  ;;  %v1023_v44 = vmul.f32 %v1684_v41, %v986_v42 }
 0x348   : > { %v1038_v45 = vmul.f32 0.5, %v1022_v43  ;;  %v1039_v46 = vmul.f32 0.5, %v1023_v44 }
 0x34a   : > { %1275 = vtanh.f32 %v1038_v45 }
 0x34b   : > { %1277 = vtanh.f32 %v1039_v46 }
 0x350   : > { %v1276_v47 = vpop.eup %1275 }
 0x351   : > { %v1278_v60 = vpop.eup %1277  ;;  %v1070_v48 = vmul.f32 0.5, %v1276_v47 }
 0x352   : > { %v1071_v49 = vmul.f32 0.5, %v1278_v60 }
 0x353   : > { %v1086_v50 = vadd.f32 1.0, %v1070_v48 }
 0x354   : > { %v1087_v26 = vadd.f32 1.0, %v1071_v49 }
 0x355   : > { %v1102_v54 = vmul.f32 %v1086_v50, %v1424_v6  ;;  %v1001_v36 = vpop.permute.xlu2 %1000  ;;  %v981_v58 = vpop.permute.xlu1 %980 }
 0x356   : > { %v1103_v59 = vmul.f32 %v1087_v26, %v1464_v16  ;;  %v1028_v61 = vmul.f32 %v1682_v35, %v1001_v36  ;;  %v1029_v0 = vmul.f32 %v1684_v41, %v1001_v36  ;;  %v1020_v8 = vmul.f32 %v1682_v35, %v981_v58 }
 0x357   : > { %1118 = vst [vmem:[%s1693_s18 + $0x10] sm:$0xff] %v1102_v54  ;;  %v1021_v13 = vmul.f32 %v1684_v41, %v981_v58 }
 0x358   : > { %1119 = vst [vmem:[%s1693_s18 + $0x18] sm:$0xff] %v1103_v59  ;;  %v1044_v18 = vmul.f32 0.5, %v1028_v61  ;;  %v1045_v19 = vmul.f32 0.5, %v1029_v0  ;;  %v1036_v20 = vmul.f32 0.5, %v1020_v8 }
 0x359   : > { %v1037_v53 = vmul.f32 0.5, %v1021_v13 }
 0x35a   : > { %1279 = vtanh.f32 %v1044_v18 }
 0x35b   : > { %1281 = vtanh.f32 %v1045_v19 }
 0x35c   : > { %1283 = vtanh.f32 %v1036_v20 }
 0x35d   : > { %1285 = vtanh.f32 %v1037_v53 }
 0x360   : > { %v1280_v6 = vpop.eup %1279 }
 0x361   : > { %v1282_v16 = vpop.eup %1281  ;;  %v1076_v51 = vmul.f32 0.5, %v1280_v6 }
 0x362   : > { %v1284_v52 = vpop.eup %1283  ;;  %v1077_v57 = vmul.f32 0.5, %v1282_v16 }
 0x363   : > { %v1286_v40 = vpop.eup %1285  ;;  %v1092_v63 = vadd.f32 1.0, %v1076_v51  ;;  %v1068_v23 = vmul.f32 0.5, %v1284_v52 }
 0x364   : > { %v1093_v55 = vadd.f32 1.0, %v1077_v57  ;;  %v1069_v24 = vmul.f32 0.5, %v1286_v40 }
 0x365   : > { %v1108_v27 = vmul.f32 %v1092_v63, %v1412_v3  ;;  %v1084_v25 = vadd.f32 1.0, %v1068_v23  ;;  %v1011_v28 = vpop.permute.xlu2 %1010  ;;  %v991_v29 = vpop.permute.xlu1 %990 }
 0x366   : > { %v1109_v30 = vmul.f32 %v1093_v55, %v1448_v12  ;;  %v1085_v32 = vadd.f32 1.0, %v1069_v24  ;;  %v1032_v33 = vmul.f32 %v1682_v35, %v1011_v28  ;;  %v1033_v34 = vmul.f32 %v1684_v41, %v1011_v28 }
 0x367   : > { %1124 = vst [vmem:[%s1693_s18 + $0x40] sm:$0xff] %v1108_v27  ;;  %v1100_v37 = vmul.f32 %v1084_v25, %v1428_v7  ;;  %v1024_v38 = vmul.f32 %v1682_v35, %v991_v29  ;;  %v1025_v21 = vmul.f32 %v1684_v41, %v991_v29 }
 0x368   : > { %1125 = vst [vmem:[%s1693_s18 + $0x48] sm:$0xff] %v1109_v30  ;;  %v1101_v3 = vmul.f32 %v1085_v32, %v1468_v17  ;;  %v1048_v39 = vmul.f32 0.5, %v1032_v33  ;;  %v1049_v56 = vmul.f32 0.5, %v1033_v34 }
 0x369   : > { %1116 = vst [vmem:[%s1693_s18] sm:$0xff] %v1100_v37  ;;  %v1040_v31 = vmul.f32 0.5, %v1024_v38  ;;  %v1041_v12 = vmul.f32 0.5, %v1025_v21  ;;  %v1307_v38 = vld [vmem:[%s1401_s14 + $0x70] sm:$0xff] }
 0x36a   : > { %1117 = vst [vmem:[%s1693_s18 + $0x8] sm:$0xff] %v1101_v3  ;;  %1287 = vtanh.f32 %v1048_v39 }
 0x36b   : > { %1289 = vtanh.f32 %v1049_v56 }
 0x36c   : > { %1291 = vtanh.f32 %v1040_v31 }
 0x36d   : > { %1293 = vtanh.f32 %v1041_v12  ;;  %v996_v62 = vpop.permute.xlu0 %995 }
 0x36e   : > { %v1026_v7 = vmul.f32 %v1682_v35, %v996_v62  ;;  %v1027_v22 = vmul.f32 %v1684_v41, %v996_v62 }
 0x370   : > { %v1288_v42 = vpop.eup %1287  ;;  %v1042_v43 = vmul.f32 0.5, %v1026_v7  ;;  %v1043_v44 = vmul.f32 0.5, %v1027_v22 }
 0x371   : > { %v1290_v45 = vpop.eup %1289  ;;  %v1080_v17 = vmul.f32 0.5, %v1288_v42 }
 0x372   : > { %v1292_v46 = vpop.eup %1291  ;;  %v1081_v47 = vmul.f32 0.5, %v1290_v45  ;;  %1295 = vtanh.f32 %v1042_v43 }
 0x373   : > { %v1294_v60 = vpop.eup %1293  ;;  %v1096_v48 = vadd.f32 1.0, %v1080_v17  ;;  %v1072_v49 = vmul.f32 0.5, %v1292_v46  ;;  %1297 = vtanh.f32 %v1043_v44 }
 0x374   : > { %v1097_v50 = vadd.f32 1.0, %v1081_v47  ;;  %v1073_v26 = vmul.f32 0.5, %v1294_v60 }
 0x375   : > { %v1112_v54 = vmul.f32 %v1096_v48, %v1405_v1  ;;  %v1088_v36 = vadd.f32 1.0, %v1072_v49  ;;  %v1006_v58 = vpop.permute.xlu1 %1005 }
 0x376   : > { %v1113_v59 = vmul.f32 %v1097_v50, %v1440_v10  ;;  %v1089_v61 = vadd.f32 1.0, %v1073_v26  ;;  %v1030_v0 = vmul.f32 %v1682_v35, %v1006_v58  ;;  %v1031_v8 = vmul.f32 %v1684_v41, %v1006_v58 }
 0x377   : > { %1128 = vst [vmem:[%s1693_s18 + $0x60] sm:$0xff] %v1112_v54  ;;  %v1104_v13 = vmul.f32 %v1088_v36, %v1420_v5 }
 0x378   : > { %v1296_v18 = vpop.eup %1295  ;;  %1129 = vst [vmem:[%s1693_s18 + $0x68] sm:$0xff] %v1113_v59  ;;  %v1105_v19 = vmul.f32 %v1089_v61, %v1460_v15  ;;  %v1046_v1 = vmul.f32 0.5, %v1030_v0  ;;  %v1047_v20 = vmul.f32 0.5, %v1031_v8 }
 0x379   : > { %v1298_v53 = vpop.eup %1297  ;;  %1120 = vst [vmem:[%s1693_s18 + $0x20] sm:$0xff] %v1104_v13  ;;  %v1074_v6 = vmul.f32 0.5, %v1296_v18 }
 0x37a   : > { %1121 = vst [vmem:[%s1693_s18 + $0x28] sm:$0xff] %v1105_v19  ;;  %v1075_v10 = vmul.f32 0.5, %v1298_v53  ;;  %1299 = vtanh.f32 %v1046_v1 }
 0x37b   : > { %v1090_v16 = vadd.f32 1.0, %v1074_v6  ;;  %1301 = vtanh.f32 %v1047_v20 }
 0x37c   : > { %v1091_v51 = vadd.f32 1.0, %v1075_v10 }
 0x37d   : > { %v1106_v5 = vmul.f32 %v1090_v16, %v1416_v4 }
 0x37e   : > { %v1107_v52 = vmul.f32 %v1091_v51, %v1455_v14 }
 0x37f   : > { %1122 = vst [vmem:[%s1693_s18 + $0x30] sm:$0xff] %v1106_v5 }
 0x380   : > { %v1300_v15 = vpop.eup %1299  ;;  %1123 = vst [vmem:[%s1693_s18 + $0x38] sm:$0xff] %v1107_v52 }
 0x381   : > { %v1302_v57 = vpop.eup %1301  ;;  %v1078_v40 = vmul.f32 0.5, %v1300_v15 }
 0x382   : > { %v1079_v63 = vmul.f32 0.5, %v1302_v57 }
 0x383   : > { %v1094_v23 = vadd.f32 1.0, %v1078_v40 }
 0x384   : > { %v1095_v55 = vadd.f32 1.0, %v1079_v63 }
 0x385   : > { %v1110_v24 = vmul.f32 %v1094_v23, %v1408_v2  ;;  %v1016_v27 = vpop.permute.xlu1 %1015 }
 0x386   : > { %v1111_v25 = vmul.f32 %v1095_v55, %v1444_v11  ;;  %v1034_v28 = vmul.f32 %v1682_v35, %v1016_v27  ;;  %v1035_v4 = vmul.f32 %v1684_v41, %v1016_v27 }
 0x387   : > { %1126 = vst [vmem:[%s1693_s18 + $0x50] sm:$0xff] %v1110_v24 }
 0x388   : > { %1127 = vst [vmem:[%s1693_s18 + $0x58] sm:$0xff] %v1111_v25  ;;  %v1050_v14 = vmul.f32 0.5, %v1034_v28  ;;  %v1051_v29 = vmul.f32 0.5, %v1035_v4 }
 0x38a   : > { %1303 = vtanh.f32 %v1050_v14 }
 0x38b   : > { %1305 = vtanh.f32 %v1051_v29 }
 0x390   : > { %v1304_v30 = vpop.eup %1303 }
 0x391   : > { %v1306_v32 = vpop.eup %1305  ;;  %v1082_v33 = vmul.f32 0.5, %v1304_v30 }
 0x392   : > { %v1083_v2 = vmul.f32 0.5, %v1306_v32 }
 0x393   : > { %v1098_v34 = vadd.f32 1.0, %v1082_v33 }
 0x394   : > { %v1099_v37 = vadd.f32 1.0, %v1083_v2 }
 0x395   : > { %v1114_v11 = vmul.f32 %v1307_v38, %v1098_v34 }
 0x396   : > { %v1115_v35 = vmul.f32 %v1099_v37, %v1435_v9 }
 0x397   : > { %1130 = vst [vmem:[%s1693_s18 + $0x70] sm:$0xff] %v1114_v11 }
 0x398   : > { %1131 = vst [vmem:[%s1693_s18 + $0x78] sm:$0xff] %v1115_v35 }
 0x399 PF: > { %s19_s30 = sadd.s32 1, %s1314_s30  }
 0x39a   : > { %p16_p4 = scmp.ge.s32.totalorder %s19_s30, 4  }
 0x39c   :  { %18 = sbr.rel (!%p16_p4) target bundleno = 1 (0x1), region = 86 }

</bundles_post_ra>
